<compile_context>
chip_gen: v7x
topology: tpu7x:2x2x1
jax: 0.10.0
libtpu: 0.0.40
codegen_flags: <defaults>
</compile_context>

<pallas_src>
import functools
import math

import jax
import jax.numpy as jnp
from jax.experimental import pallas as pl
from jax.experimental.pallas import tpu as pltpu


def _round_up(x, m):
    return (x + m - 1) // m * m


def _pad2(a, shape, dtype=None):
    out = jnp.zeros(shape, a.dtype if dtype is None else dtype)
    return out.at[: a.shape[0], : a.shape[1]].set(a.astype(out.dtype))


# --------------------------------------------------------------------------
# One GraphConvolution layer (+ fused activation) as a tiled Pallas kernel.
# Grid: (row blocks of adj, k blocks of adj).  For each (i, k):
#   s   = x[k_tile] @ W                      (bf16 x bf16 -> f32)
#   acc += adj[i_tile, k_tile] @ bf16(s)     (bf16 x bf16 -> f32)
# On the last k block: out[i_tile] = act(acc + b).
# --------------------------------------------------------------------------
def gcn_layer_kernel(adj_ref, x_ref, w_ref, b_ref, out_ref, acc_ref,
                     *, activation, valid_cols):
    k = pl.program_id(1)

    @pl.when(k == 0)
    def _():
        acc_ref[...] = jnp.zeros_like(acc_ref)

    # Feature projection for this k-tile of nodes (bf16 MXU, f32 accumulate).
    s = jnp.dot(x_ref[...], w_ref[...], preferred_element_type=jnp.float32)
    # Aggregate over the k-tile of neighbours.
    acc_ref[...] += jnp.dot(adj_ref[...], s.astype(jnp.bfloat16),
                            preferred_element_type=jnp.float32)

    @pl.when(k == pl.num_programs(1) - 1)
    def _():
        h = acc_ref[...] + b_ref[...]                      # f32, (tm, Op)
        if activation == "relu6":
            out_ref[...] = jnp.clip(h, 0.0, 6.0).astype(out_ref.dtype)
        else:  # masked log_softmax over the (padded) class axis
            col = jax.lax.broadcasted_iota(jnp.int32, h.shape, 1)
            h = jnp.where(col < valid_cols, h, -1e30)       # exclude pad cols
            m = jnp.max(h, axis=-1, keepdims=True)
            z = h - m
            lse = jnp.log(jnp.sum(jnp.exp(z), axis=-1, keepdims=True))
            out_ref[...] = (z - lse).astype(out_ref.dtype)


def gcn_layer(adj, x, w, b, *, activation, valid_cols, out_dtype,
              tm=128, tk=128):
    """adj:(Np,Np) bf16, x:(Np,Fp) bf16, w:(Fp,Op) bf16, b:(1,Op) f32."""
    n_p = adj.shape[0]
    f_p = x.shape[1]
    o_p = w.shape[1]
    assert n_p % tm == 0 and n_p % tk == 0

    kernel = functools.partial(gcn_layer_kernel,
                               activation=activation, valid_cols=valid_cols)
    return pl.pallas_call(
        kernel,
        out_shape=jax.ShapeDtypeStruct((n_p, o_p), out_dtype),
        grid_spec=pltpu.PrefetchScalarGridSpec(
            num_scalar_prefetch=0,
            grid=(n_p // tm, n_p // tk),
            in_specs=[
                pl.BlockSpec((tm, tk), lambda i, k: (i, k)),   # adj tile
                pl.BlockSpec((tk, f_p), lambda i, k: (k, 0)),  # node features
                pl.BlockSpec((f_p, o_p), lambda i, k: (0, 0)),  # weight (resident)
                pl.BlockSpec((1, o_p), lambda i, k: (0, 0)),    # bias
            ],
            out_specs=pl.BlockSpec((tm, o_p), lambda i, k: (i, 0)),
            scratch_shapes=[pltpu.VMEM((tm, o_p), jnp.float32)],
        ),
        compiler_params=pltpu.CompilerParams(
            # row axis parallel (v7x 2-TC sharding), reduction axis arbitrary
            dimension_semantics=("parallel", "arbitrary"),
            vmem_limit_bytes=64 * 1024 * 1024,
        ),
    )(adj, x, w, b)


# --------------------------------------------------------------------------
# Full GCN forward: gc1 -> relu6 -> (dropout, eval: identity) -> gc6 -> log_softmax
# --------------------------------------------------------------------------
def gcn_forward(x, adj, w1, b1, w6, b6, *, tm=128, tk=128):
    n, nfeat = x.shape
    nhid = w1.shape[1]
    nclass = w6.shape[1]

    n_p = _round_up(n, max(tm, tk))
    f_p = _round_up(nfeat, 128)
    h_p = _round_up(nhid, 128)
    c_p = _round_up(nclass, 128)

    # Zero padding is exact: padded adj rows/cols and padded weight rows/cols
    # contribute nothing to the real output rows/columns.
    adj_p = _pad2(adj, (n_p, n_p), jnp.bfloat16)
    x_p = _pad2(x, (n_p, f_p), jnp.bfloat16)
    w1_p = _pad2(w1, (f_p, h_p), jnp.bfloat16)
    b1_p = _pad2(b1, (1, h_p), jnp.float32)
    w6_p = _pad2(w6, (h_p, c_p), jnp.bfloat16)
    b6_p = _pad2(b6, (1, c_p), jnp.float32)

    # Layer 1: hidden features kept bf16 (they are MXU operands of layer 2).
    h = gcn_layer(adj_p, x_p, w1_p, b1_p, activation="relu6",
                  valid_cols=nhid, out_dtype=jnp.bfloat16, tm=tm, tk=tk)
    # Layer 2: lane-dense (n_p, c_p) f32 output slab, masked log_softmax.
    out_p = gcn_layer(adj_p, h, w6_p, b6_p, activation="log_softmax",
                      valid_cols=nclass, out_dtype=jnp.float32, tm=tm, tk=tk)
    return out_p[:n, :nclass]


def init_gc_params(key, in_features, out_features):
    # Matches GraphConvolution.reset_parameters: uniform(-stdv, stdv),
    # stdv = 1/sqrt(out_features).
    stdv = 1.0 / math.sqrt(out_features)
    kw, kb = jax.random.split(key)
    w = jax.random.uniform(kw, (in_features, out_features), jnp.float32,
                           minval=-stdv, maxval=stdv)
    b = jax.random.uniform(kb, (1, out_features), jnp.float32,
                           minval=-stdv, maxval=stdv)
    return w, b


def ref_forward(x, adj, w1, b1, w6, b6):
    # Plain-JAX reference with the SAME bf16 operand casts as the kernel.
    xb, adjb = x.astype(jnp.bfloat16), adj.astype(jnp.bfloat16)
    s1 = jnp.dot(xb, w1.astype(jnp.bfloat16), preferred_element_type=jnp.float32)
    h = jnp.dot(adjb, s1.astype(jnp.bfloat16),
                preferred_element_type=jnp.float32) + b1
    h = jnp.clip(h, 0.0, 6.0).astype(jnp.bfloat16)
    s2 = jnp.dot(h, w6.astype(jnp.bfloat16), preferred_element_type=jnp.float32)
    logits = jnp.dot(adjb, s2.astype(jnp.bfloat16),
                     preferred_element_type=jnp.float32) + b6
    return jax.nn.log_softmax(logits, axis=1)


if __name__ == "__main__":
    # Small shapes consistent with the module: N nodes, nfeat -> nhid -> nclass.
    N, nfeat, nhid, nclass = 16, 32, 32, 8

    key = jax.random.PRNGKey(0)
    kx, kadj, k1, k6 = jax.random.split(key, 4)

    x = jax.random.normal(kx, (N, nfeat), jnp.float32)

    # Symmetric normalized adjacency with self-loops (typical GCN input).
    a = (jax.random.uniform(kadj, (N, N)) < 0.3).astype(jnp.float32)
    a = jnp.maximum(a, a.T)
    a = a + jnp.eye(N, dtype=jnp.float32)
    deg = jnp.sum(a, axis=1)
    dinv = 1.0 / jnp.sqrt(deg)
    adj = a * dinv[:, None] * dinv[None, :]

    w1, b1 = init_gc_params(k1, nfeat, nhid)
    w6, b6 = init_gc_params(k6, nhid, nclass)

    out = gcn_forward(x, adj, w1, b1, w6, b6)
    jax.block_until_ready(out)

    ref = ref_forward(x, adj, w1, b1, w6, b6)
    assert out.shape == (N, nclass)
    assert jnp.all(jnp.isfinite(out))
    assert jnp.allclose(out, ref, atol=5e-3, rtol=5e-3)

    print("KERNEL_OK")
</pallas_src>

<mosaic_0001>
module attributes {stable_mosaic.version = 11 : i64} {
  func.func @gcn_layer_kernel(%arg0: i32, %arg1: i32, %arg2: memref<128x128xbf16, #tpu.memory_space<vmem>>, %arg3: memref<128x128xbf16, #tpu.memory_space<vmem>>, %arg4: memref<128x128xbf16, #tpu.memory_space<vmem>>, %arg5: memref<1x128xf32, #tpu.memory_space<vmem>>, %arg6: memref<128x128xbf16, #tpu.memory_space<vmem>>, %arg7: memref<128x128xf32, #tpu.memory_space<vmem>>) attributes {dimension_semantics = [#tpu.dimension_semantics<parallel>, #tpu.dimension_semantics<arbitrary>], iteration_bounds = array<i64: 1, 1>, scalar_prefetch = 0 : i64, scratch_operands = 1 : i64, tpu.core_type = #tpu.core_type<tc>, window_params = [{transform_indices = @transform_0, window_bounds = array<i64: 128, 128>}, {transform_indices = @transform_1, window_bounds = array<i64: 128, 128>}, {pipeline_mode = #tpu.pipeline_mode<synchronous>, transform_indices = @transform_2, window_bounds = array<i64: 128, 128>}, {pipeline_mode = #tpu.pipeline_mode<synchronous>, transform_indices = @transform_3, window_bounds = array<i64: 1, 128>}, {transform_indices = @transform_4, window_bounds = array<i64: 128, 128>}]} {
    %c0_i32 = arith.constant 0 : i32
    %0 = arith.cmpi eq, %arg1, %c0_i32 : i32
    %1 = arith.extui %0 : i1 to i32
    %c0_i32_0 = arith.constant 0 : i32
    %2 = arith.cmpi ne, %1, %c0_i32_0 : i32
    scf.if %2 {
      %cst_13 = arith.constant 0.000000e+00 : f32
      %15 = vector.broadcast %cst_13 : f32 to vector<128x128xf32>
      %c0_14 = arith.constant 0 : index
      %c0_15 = arith.constant 0 : index
      %16 = vector.load %arg7[%c0_14, %c0_15] : memref<128x128xf32, #tpu.memory_space<vmem>>, vector<128x128xf32>
      tpu.vector_store %arg7[%c0_14, %c0_15], %15 {strides = array<i32>} : memref<128x128xf32, #tpu.memory_space<vmem>>, vector<128x128xf32>,
    } else {
    }
    %c0 = arith.constant 0 : index
    %c0_1 = arith.constant 0 : index
    %3 = vector.load %arg3[%c0, %c0_1] : memref<128x128xbf16, #tpu.memory_space<vmem>>, vector<128x128xbf16>
    %c0_2 = arith.constant 0 : index
    %c0_3 = arith.constant 0 : index
    %4 = vector.load %arg4[%c0_2, %c0_3] : memref<128x128xbf16, #tpu.memory_space<vmem>>, vector<128x128xbf16>
    %cst = arith.constant dense<0.000000e+00> : vector<128x128xf32>
    %5 = tpu.matmul %3, %4, %cst {dimension_numbers = #tpu.dot_dimension_numbers<[1], [0], [0], [1], [0, 0, 1, 1], [], []>} : vector<128x128xbf16>, vector<128x128xbf16>, vector<128x128xf32> -> vector<128x128xf32>
    %c0_4 = arith.constant 0 : index
    %c0_5 = arith.constant 0 : index
    %6 = vector.load %arg7[%c0_4, %c0_5] : memref<128x128xf32, #tpu.memory_space<vmem>>, vector<128x128xf32>
    %c0_6 = arith.constant 0 : index
    %c0_7 = arith.constant 0 : index
    %7 = vector.load %arg2[%c0_6, %c0_7] : memref<128x128xbf16, #tpu.memory_space<vmem>>, vector<128x128xbf16>
    %8 = arith.truncf %5 : vector<128x128xf32> to vector<128x128xbf16>
    %cst_8 = arith.constant dense<0.000000e+00> : vector<128x128xf32>
    %9 = tpu.matmul %7, %8, %cst_8 {dimension_numbers = #tpu.dot_dimension_numbers<[1], [0], [0], [1], [0, 0, 1, 1], [], []>} : vector<128x128xbf16>, vector<128x128xbf16>, vector<128x128xf32> -> vector<128x128xf32>
    %10 = arith.addf %6, %9 : vector<128x128xf32>
    %c0_9 = arith.constant 0 : index
    %c0_10 = arith.constant 0 : index
    %11 = vector.load %arg7[%c0_9, %c0_10] : memref<128x128xf32, #tpu.memory_space<vmem>>, vector<128x128xf32>
    tpu.vector_store %arg7[%c0_9, %c0_10], %10 {strides = array<i32>} : memref<128x128xf32, #tpu.memory_space<vmem>>, vector<128x128xf32>,
    %c0_i32_11 = arith.constant 0 : i32
    %12 = arith.cmpi eq, %arg1, %c0_i32_11 : i32
    %13 = arith.extui %12 : i1 to i32
    %c0_i32_12 = arith.constant 0 : i32
    %14 = arith.cmpi ne, %13, %c0_i32_12 : i32
    scf.if %14 {
      %c0_13 = arith.constant 0 : index
      %c0_14 = arith.constant 0 : index
      %15 = vector.load %arg7[%c0_13, %c0_14] : memref<128x128xf32, #tpu.memory_space<vmem>>, vector<128x128xf32>
      %c0_15 = arith.constant 0 : index
      %c0_16 = arith.constant 0 : index
      %16 = vector.load %arg5[%c0_15, %c0_16] : memref<1x128xf32, #tpu.memory_space<vmem>>, vector<1x128xf32>
      %17 = vector.broadcast %16 : vector<1x128xf32> to vector<128x128xf32>
      %18 = arith.addf %15, %17 : vector<128x128xf32>
      %cst_17 = arith.constant 0.000000e+00 : f32
      %cst_18 = arith.constant 6.000000e+00 : f32
      %19 = vector.broadcast %cst_17 : f32 to vector<128x128xf32>
      %20 = arith.maximumf %19, %18 : vector<128x128xf32>
      %21 = vector.broadcast %cst_18 : f32 to vector<128x128xf32>
      %22 = arith.minimumf %21, %20 : vector<128x128xf32>
      %23 = arith.truncf %22 : vector<128x128xf32> to vector<128x128xbf16>
      %c0_19 = arith.constant 0 : index
      %c0_20 = arith.constant 0 : index
      %24 = vector.load %arg6[%c0_19, %c0_20] : memref<128x128xbf16, #tpu.memory_space<vmem>>, vector<128x128xbf16>
      tpu.vector_store %arg6[%c0_19, %c0_20], %23 {strides = array<i32>} : memref<128x128xbf16, #tpu.memory_space<vmem>>, vector<128x128xbf16>,
    } else {
    }
    return
  }
  func.func @transform_0(%arg0: i32, %arg1: i32) -> (i32, i32) {
    %c0_i32 = arith.constant 0 : i32
    return %arg0, %arg1 : i32, i32
  }
  func.func @transform_1(%arg0: i32, %arg1: i32) -> (i32, i32) {
    %c0_i32 = arith.constant 0 : i32
    %c0_i32_0 = arith.constant 0 : i32
    return %arg1, %c0_i32 : i32, i32
  }
  func.func @transform_2(%arg0: i32, %arg1: i32) -> (i32, i32) {
    %c0_i32 = arith.constant 0 : i32
    %c0_i32_0 = arith.constant 0 : i32
    %c0_i32_1 = arith.constant 0 : i32
    return %c0_i32, %c0_i32_0 : i32, i32
  }
  func.func @transform_3(%arg0: i32, %arg1: i32) -> (i32, i32) {
    %c0_i32 = arith.constant 0 : i32
    %c0_i32_0 = arith.constant 0 : i32
    %c0_i32_1 = arith.constant 0 : i32
    return %c0_i32, %c0_i32_0 : i32, i32
  }
  func.func @transform_4(%arg0: i32, %arg1: i32) -> (i32, i32) {
    %c0_i32 = arith.constant 0 : i32
    %c0_i32_0 = arith.constant 0 : i32
    return %arg0, %c0_i32 : i32, i32
  }
}

</mosaic_0001>

<bundles_post_ra>
// kernel: tpu_custom_call.1
= control target key start
LH: loop header
LB: loop body
LE: loop exit
PB: predicated region body
PF: predicated region fallthrough
CT: control target
= control target key end

     0   :  { %9 = vsyncpa [#allocation4], 0  ;;  %s1185_s0 = inlined_call_operand.hbm [shape: bf16[128,128], index: 0, kind: input, shape index: {}]   ;;  %s1186_s1 = inlined_call_operand.hbm [shape: bf16[128,128], index: 1, kind: input, shape index: {}]   ;;  %s1187_s2 = inlined_call_operand.hbm [shape: bf16[128,128], index: 2, kind: input, shape index: {}]   ;;  %s1188_s3 = inlined_call_operand.hbm [shape: f32[1,128], index: 3, kind: input, shape index: {}]   ;;  %s1189_s4 = inlined_call_operand.hbm [shape: bf16[128,128], index: 4, kind: output, shape index: {}]  }
   0x1   :  { %10 = vsyncpa [#allocation7], 0 }
   0x2   :  { %11 = vsyncpa [#allocation10], 0 }
   0x3   :  { %12 = vsyncpa [#allocation5], 0  ;;  %s1056_s15 = smov [#allocation6]   ;;  %s1057_s17 = smov [#allocation3]  }
   0x4   :  { %s30_s16 = sshll.u32 %s1056_s15, 4  ;;  %s18_s18 = sshll.u32 %s1057_s17, 4  ;;  %s31_s16 = int_to_ptr.vmem [resolvable:$true] %s30_s16  ;;  %s1088_s18 = int_to_ptr.vmem [resolvable:$true] %s18_s18 }
   0x5   :  { %s938_s21 = scalar_lea.hbm %s1186_s1, 1024 }
   0x6   :  { %p939_p0 = scmp.ne.s32.totalorder %s1186_s1, %s938_s21  ;;  %p942_p1 = scmp.lt.u32.totalorder %s938_s21, %s1186_s1 }
   0x8   :  { %p944_p2 = pnand %p942_p1, %p939_p0 }
   0xa   :  { %947 = shalt.err (!%p944_p2)
}
   0xb   :  { %s948_s26 = scalar_lea.vmem %s31_s16, 1024  ;;  %p953_p4 = scmp.lt.s32.totalorder %s31_s16, %s31_s16 }
   0xc   :  { %p949_p3 = scmp.ne.s32.totalorder %s31_s16, %s948_s26  ;;  %p954_p5 = scmp.lt.s32.totalorder %s948_s26, %s948_s26 }
   0xe   :  { %p955_p6 = por %p954_p5, %p953_p4 }
  0x10   :  { %p956_p7 = pnand %p955_p6, %p949_p3 }
  0x12   :  { %959 = shalt.err (!%p956_p7)
}
  0x13   :  { %s1058_s27 = smov 64   ;;  %s1059_s28 = smov 4  }
  0x14   :  { %36 = dma.hbm_to_vmem [thread:$0]  %s1186_s1, 1024, %s31_s16, [#allocation7], %s1058_s27, %s1058_s27, %s1059_s28  }
  0x15   :  { %s960_s7 = scalar_lea.hbm %s1185_s0, 1024 }
  0x16   :  { %p961_p8 = scmp.ne.s32.totalorder %s1185_s0, %s960_s7  ;;  %p964_p9 = scmp.lt.u32.totalorder %s960_s7, %s1185_s0 }
  0x18   :  { %p966_p10 = pnand %p964_p9, %p961_p8 }
  0x1a   :  { %969 = shalt.err (!%p966_p10)
}
  0x1b   :  { %s970_s12 = scalar_lea.vmem %s1088_s18, 1024  ;;  %p975_p12 = scmp.lt.s32.totalorder %s1088_s18, %s1088_s18 }
  0x1c   :  { %p971_p11 = scmp.ne.s32.totalorder %s1088_s18, %s970_s12  ;;  %p976_p13 = scmp.lt.s32.totalorder %s970_s12, %s970_s12 }
  0x1e   :  { %p977_p0 = por %p976_p13, %p975_p12 }
  0x20   :  { %p978_p1 = pnand %p977_p0, %p971_p11 }
  0x22   :  { %981 = shalt.err (!%p978_p1)
}
  0x23   :  { %24 = dma.hbm_to_vmem [thread:$0]  %s1185_s0, 1024, %s1088_s18, [#allocation4], %s1058_s27, %s1058_s27, %s1059_s28  }
  0x24   :  { %s1060_s14 = smov [#allocation8]   ;;  %s1061_s16 = smov [#allocation9]  }
  0x25   :  { %s42_s15 = sshll.u32 %s1060_s14, 4  ;;  %s55_s17 = sshll.u32 %s1061_s16, 4  ;;  %s43_s15 = int_to_ptr.vmem [resolvable:$true] %s42_s15  ;;  %s56_s17 = int_to_ptr.vmem [resolvable:$true] %s55_s17 }
  0x26   :  { %s982_s21 = scalar_lea.hbm %s1187_s2, 1024 }
  0x27   :  { %p983_p2 = scmp.ne.s32.totalorder %s1187_s2, %s982_s21  ;;  %p986_p3 = scmp.lt.u32.totalorder %s982_s21, %s1187_s2 }
  0x29   :  { %p988_p4 = pnand %p986_p3, %p983_p2 }
  0x2b   :  { %991 = shalt.err (!%p988_p4)
}
  0x2c   :  { %s992_s0 = scalar_lea.vmem %s43_s15, 1024  ;;  %p997_p6 = scmp.lt.s32.totalorder %s43_s15, %s43_s15 }
  0x2d   :  { %p993_p5 = scmp.ne.s32.totalorder %s43_s15, %s992_s0  ;;  %p998_p7 = scmp.lt.s32.totalorder %s992_s0, %s992_s0 }
  0x2f   :  { %p999_p8 = por %p998_p7, %p997_p6 }
  0x31   :  { %p1000_p9 = pnand %p999_p8, %p993_p5 }
  0x33   :  { %1003 = shalt.err (!%p1000_p9)
}
  0x34   :  { %48 = dma.hbm_to_vmem [thread:$0]  %s1187_s2, 1024, %s43_s15, [#allocation7], %s1058_s27, %s1058_s27, %s1059_s28  }
  0x35   :  { %s1004_s5 = scalar_lea.hbm %s1188_s3, 16 }
  0x36   :  { %p1005_p10 = scmp.ne.s32.totalorder %s1188_s3, %s1004_s5  ;;  %p1008_p11 = scmp.lt.u32.totalorder %s1004_s5, %s1188_s3 }
  0x38   :  { %p1010_p12 = pnand %p1008_p11, %p1005_p10 }
  0x3a   :  { %1013 = shalt.err (!%p1010_p12)
}
  0x3b   :  { %s1014_s10 = scalar_lea.vmem %s56_s17, 16  ;;  %s1018_s11 = scalar_lea.vmem %s56_s17, 32 }
  0x3c   :  { %p1015_p13 = scmp.ne.s32.totalorder %s56_s17, %s1014_s10  ;;  %p1019_p0 = scmp.lt.s32.totalorder %s56_s17, %s56_s17 }
  0x3d   :  { %p1020_p1 = scmp.lt.s32.totalorder %s1018_s11, %s1014_s10 }
  0x3f   :  { %p1021_p2 = por %p1020_p1, %p1019_p0 }
  0x41   :  { %p1022_p3 = pnand %p1021_p2, %p1015_p13 }
  0x43   :  { %1025 = shalt.err (!%p1022_p3)
}
  0x44   :  { %58 = dma.hbm_to_vmem [thread:$0]  %s1188_s3, 16, %s56_s17, [#allocation10]  }
  0x45   :  { %1048 = dma.done.wait [#allocation4], 1024  }
  0x46   :  { %1049 = vsyncadd [#allocation4], 4294966272 }
  0x47   :  { %1050 = dma.done.wait [#allocation7], 2048  }
  0x48   :  { %1051 = vsyncadd [#allocation7], 4294965248 }
  0x49   :  { %1052 = dma.done.wait [#allocation10], 16  }
  0x4a   :  { %1053 = vsyncadd [#allocation10], 4294967280  ;;  %v914_v0 = vld [vmem:[#allocation8] sm:$0xff]   ;;  %v915_v1 = vld [vmem:[#allocation8 + $0x8] sm:$0xff]   ;;  %s1062_s3 = smov [#allocation11]  }
  0x4b   :  { %843 = vmatprep.subr.bf16.mxu0 %v914_v0  ;;  %v916_v2 = vld [vmem:[#allocation8 + $0x10] sm:$0xff]   ;;  %v917_v3 = vld [vmem:[#allocation8 + $0x18] sm:$0xff]   ;;  %v922_v4 = vld [vmem:[#allocation6] sm:$0xff]   ;;  %s693_s1 = sshll.u32 %s1062_s3, 4  ;;  %s694_s1 = int_to_ptr.vmem [resolvable:$true] %s693_s1 }
  0x4c   :  { %844 = vmatpush3.bf16.msra.mxu0 %v914_v0  ;;  %859 = vmatprep.mubr.bf16.mxu0 %v922_v4  ;;  %v918_v5 = vld [vmem:[#allocation8 + $0x20] sm:$0xff]   ;;  %v919_v6 = vld [vmem:[#allocation8 + $0x28] sm:$0xff]   ;;  %v920_v7 = vld [vmem:[#allocation8 + $0x30] sm:$0xff]   ;;  %s1026_s13 = scalar_lea.vmem %s694_s1, 1024  ;;  %p1031_p5 = scmp.lt.s32.totalorder %s694_s1, %s694_s1 }
  0x4d   :  { %845 = vmatprep.subr.bf16.mxu0 %v915_v1  ;;  %v921_v8 = vld [vmem:[#allocation8 + $0x38] sm:$0xff]   ;;  %v923_v9 = vld [vmem:[#allocation6 + $0x8] sm:$0xff]   ;;  %v924_v10 = vld [vmem:[#allocation6 + $0x10] sm:$0xff]   ;;  %p1027_p4 = scmp.ne.s32.totalorder %s694_s1, %s1026_s13  ;;  %p1032_p6 = scmp.lt.s32.totalorder %s1026_s13, %s1026_s13 }
  0x4e   :  { %v925_v11 = vld [vmem:[#allocation6 + $0x18] sm:$0xff]   ;;  %v926_v12 = vld [vmem:[#allocation6 + $0x20] sm:$0xff]   ;;  %v927_v13 = vld [vmem:[#allocation6 + $0x28] sm:$0xff]  }
  0x4f   :  { %v928_v14 = vld [vmem:[#allocation6 + $0x30] sm:$0xff]   ;;  %v929_v15 = vld [vmem:[#allocation6 + $0x38] sm:$0xff]   ;;  %v930_v16 = vld [vmem:[#allocation3] sm:$0xff]   ;;  %p1033_p7 = por %p1032_p6, %p1031_p5 }
  0x50   :  { %846 = vmatpush3.bf16.msra.mxu0 %v915_v1  ;;  %891 = vmatprep.mubr.bf16.mxu1 %v930_v16  ;;  %v931_v41 = vld [vmem:[#allocation3 + $0x8] sm:$0xff]   ;;  %v932_v42 = vld [vmem:[#allocation3 + $0x10] sm:$0xff]   ;;  %v933_v43 = vld [vmem:[#allocation3 + $0x18] sm:$0xff]  }
  0x51   :  { %847 = vmatprep.subr.bf16.mxu0 %v916_v2  ;;  %v934_v44 = vld [vmem:[#allocation3 + $0x20] sm:$0xff]   ;;  %v935_v45 = vld [vmem:[#allocation3 + $0x28] sm:$0xff]   ;;  %v936_v46 = vld [vmem:[#allocation3 + $0x30] sm:$0xff]   ;;  %p1034_p8 = pnand %p1033_p7, %p1027_p4 }
  0x52   :  { %v937_v47 = vld [vmem:[#allocation3 + $0x38] sm:$0xff]   ;;  %v1152_v48 = vld [vmem:[#allocation9] ss:$0 sm:$0xff] }
  0x54   :  { %848 = vmatpush3.bf16.msra.mxu0 %v916_v2 }
  0x55   :  { %849 = vmatprep.subr.bf16.mxu0 %v917_v3 }
  0x58   :  { %850 = vmatpush3.bf16.msra.mxu0 %v917_v3 }
  0x59   :  { %851 = vmatprep.subr.bf16.mxu0 %v918_v5 }
  0x5c   :  { %852 = vmatpush3.bf16.msra.mxu0 %v918_v5 }
  0x5d   :  { %853 = vmatprep.subr.bf16.mxu0 %v919_v6 }
  0x60   :  { %854 = vmatpush3.bf16.msra.mxu0 %v919_v6 }
  0x61   :  { %855 = vmatprep.subr.bf16.mxu0 %v920_v7 }
  0x64   :  { %856 = vmatpush3.bf16.msra.mxu0 %v920_v7 }
  0x65   :  { %857 = vmatprep.subr.bf16.mxu0 %v921_v8 }
  0x68   :  { %858 = vmatpush3.bf16.msra.mxu0 %v921_v8 }
  0x6b   :  { %860 = vmatmul.mubr.bf16.vlgmr.msra.gmra.mrb[0].mxu0 %v923_v9 }
  0x6c   :  { %863 = vmatprep.mubr.bf16.mxu0 %v924_v10 }
  0x73   :  { %864 = vmatmul.mubr.bf16.gmra.mrb[4].mxu0 %v925_v11 }
  0x74   :  { %867 = vmatprep.mubr.bf16.mxu0 %v926_v12 }
  0x7b   :  { %868 = vmatmul.mubr.bf16.gmra.mrb[8].mxu0 %v927_v13 }
  0x7c   :  { %871 = vmatprep.mubr.bf16.mxu0 %v928_v14 }
  0x83   :  { %872 = vmatmul.mubr.bf16.gmra.mrb[12].mxu0 %v929_v15 }
 0x13e   :  { %v861_v17 = vpop.f32.mrb[0].mxu0 }
 0x13f   :  { %v254_v18 = vpop.f32.mrb[1].mxu0 }
 0x140   :  { %v862_v19 = vpop.f32.mrb[2].mxu0 }
 0x141   :  { %v350_v20 = vpack.c.bf16 %v862_v19, %v861_v17  ;;  %v257_v21 = vpop.f32.mrb[3].mxu0 }
 0x142   :  { %v349_v22 = vpack.c.bf16 %v257_v21, %v254_v18 }
 0x144   :  { %875 = vmatprep.subr.bf16.mxu1 %v349_v22 }
 0x145   :  { %876 = vmatpush3.bf16.msra.mxu1 %v349_v22 }
 0x146   :  { %v865_v23 = vpop.f32.mrb[4].mxu0  ;;  %877 = vmatprep.subr.bf16.mxu1 %v350_v20 }
 0x147   :  { %v270_v24 = vpop.f32.mrb[5].mxu0 }
 0x148   :  { %v866_v25 = vpop.f32.mrb[6].mxu0 }
 0x149   :  { %v352_v26 = vpack.c.bf16 %v866_v25, %v865_v23  ;;  %v273_v27 = vpop.f32.mrb[7].mxu0  ;;  %878 = vmatpush3.bf16.msra.mxu1 %v350_v20 }
 0x14a   :  { %v351_v28 = vpack.c.bf16 %v273_v27, %v270_v24 }
 0x14c   :  { %879 = vmatprep.subr.bf16.mxu1 %v351_v28 }
 0x14d   :  { %880 = vmatpush3.bf16.msra.mxu1 %v351_v28 }
 0x14e   :  { %v869_v29 = vpop.f32.mrb[8].mxu0  ;;  %881 = vmatprep.subr.bf16.mxu1 %v352_v26 }
 0x14f   :  { %v286_v30 = vpop.f32.mrb[9].mxu0 }
 0x150   :  { %v870_v31 = vpop.f32.mrb[10].mxu0 }
 0x151   :  { %v354_v32 = vpack.c.bf16 %v870_v31, %v869_v29  ;;  %v289_v33 = vpop.f32.mrb[11].mxu0  ;;  %882 = vmatpush3.bf16.msra.mxu1 %v352_v26 }
 0x152   :  { %v353_v34 = vpack.c.bf16 %v289_v33, %v286_v30 }
 0x154   :  { %883 = vmatprep.subr.bf16.mxu1 %v353_v34 }
 0x155   :  { %884 = vmatpush3.bf16.msra.mxu1 %v353_v34 }
 0x156   :  { %v873_v35 = vpop.f32.mrb[12].mxu0  ;;  %885 = vmatprep.subr.bf16.mxu1 %v354_v32 }
 0x157   :  { %v302_v36 = vpop.f32.mrb[13].mxu0 }
 0x158   :  { %v874_v37 = vpop.f32.mrb[14].mxu0 }
 0x159   :  { %v356_v38 = vpack.c.bf16 %v874_v37, %v873_v35  ;;  %v305_v39 = vpop.f32.mrb[15].mxu0  ;;  %886 = vmatpush3.bf16.msra.mxu1 %v354_v32 }
 0x15a   :  { %v355_v40 = vpack.c.bf16 %v305_v39, %v302_v36 }
 0x15c   :  { %887 = vmatprep.subr.bf16.mxu1 %v355_v40 }
 0x15d   :  { %888 = vmatpush3.bf16.msra.mxu1 %v355_v40 }
 0x15e   :  { %889 = vmatprep.subr.bf16.mxu1 %v356_v38 }
 0x161   :  { %890 = vmatpush3.bf16.msra.mxu1 %v356_v38 }
 0x164   :  { %892 = vmatmul.mubr.bf16.vlgmr.msra.gmra.mrb[0].mxu1 %v931_v41 }
 0x165   :  { %895 = vmatprep.mubr.bf16.mxu1 %v932_v42 }
 0x16c   :  { %896 = vmatmul.mubr.bf16.gmra.mrb[4].mxu1 %v933_v43 }
 0x16d   :  { %899 = vmatprep.mubr.bf16.mxu1 %v934_v44 }
 0x174   :  { %900 = vmatmul.mubr.bf16.gmra.mrb[8].mxu1 %v935_v45 }
 0x175   :  { %903 = vmatprep.mubr.bf16.mxu1 %v936_v46 }
 0x17c   :  { %904 = vmatmul.mubr.bf16.gmra.mrb[12].mxu1 %v937_v47 }
 0x237   :  { %v893_v49 = vpop.f32.mrb[0].mxu1 }
 0x238   :  { %v562_v50 = vadd.f32 %v893_v49, %v1152_v48  ;;  %v439_v51 = vpop.f32.mrb[1].mxu1 }
 0x239   :  { %v560_v52 = vadd.f32 %v1152_v48, %v439_v51  ;;  %v894_v53 = vpop.f32.mrb[2].mxu1 }
 0x23a   :  { %v578_v54 = vmax.f32 %v562_v50, 0.0  ;;  %v563_v55 = vadd.f32 %v894_v53, %v1152_v48  ;;  %v442_v56 = vpop.f32.mrb[3].mxu1 }
 0x23b   :  { %v576_v57 = vmax.f32 %v560_v52, 0.0  ;;  %v561_v58 = vadd.f32 %v1152_v48, %v442_v56 }
 0x23c   :  { %v579_v59 = vmax.f32 %v563_v55, 0.0  ;;  %v594_v61 = vmin.f32 %v578_v54, 6.0 }
 0x23d   :  { %v577_v60 = vmax.f32 %v561_v58, 0.0  ;;  %v592_v63 = vmin.f32 %v576_v57, 6.0 }
 0x23e   :  { %v595_v62 = vmin.f32 %v579_v59, 6.0 }
 0x23f   :  { %v593_v0 = vmin.f32 %v577_v60, 6.0  ;;  %v897_v1 = vpop.f32.mrb[4].mxu1 }
 0x240   :  { %v772_v2 = vpack.c.bf16 %v595_v62, %v594_v61  ;;  %v566_v3 = vadd.f32 %v897_v1, %v1152_v48  ;;  %v455_v4 = vpop.f32.mrb[5].mxu1 }
 0x241   :  { %v767_v5 = vpack.c.bf16 %v593_v0, %v592_v63  ;;  %v564_v6 = vadd.f32 %v1152_v48, %v455_v4  ;;  %v898_v7 = vpop.f32.mrb[6].mxu1 }
 0x242   :  { %804 = vst [vmem:[#allocation11 + $0x8] sm:$0xff] %v772_v2   ;;  %v582_v8 = vmax.f32 %v566_v3, 0.0  ;;  %v567_v9 = vadd.f32 %v898_v7, %v1152_v48  ;;  %v458_v10 = vpop.f32.mrb[7].mxu1 }
 0x243   :  { %768 = vst [vmem:[#allocation11] sm:$0xff] %v767_v5   ;;  %v580_v11 = vmax.f32 %v564_v6, 0.0  ;;  %v565_v12 = vadd.f32 %v1152_v48, %v458_v10 }
 0x244   :  { %v583_v13 = vmax.f32 %v567_v9, 0.0  ;;  %v598_v15 = vmin.f32 %v582_v8, 6.0 }
 0x245   :  { %v581_v14 = vmax.f32 %v565_v12, 0.0  ;;  %v596_v17 = vmin.f32 %v580_v11, 6.0 }
 0x246   :  { %v599_v16 = vmin.f32 %v583_v13, 6.0 }
 0x247   :  { %v597_v18 = vmin.f32 %v581_v14, 6.0  ;;  %v901_v19 = vpop.f32.mrb[8].mxu1 }
 0x248   :  { %v782_v20 = vpack.c.bf16 %v599_v16, %v598_v15  ;;  %v570_v21 = vadd.f32 %v901_v19, %v1152_v48  ;;  %v471_v22 = vpop.f32.mrb[9].mxu1 }
 0x249   :  { %v777_v23 = vpack.c.bf16 %v597_v18, %v596_v17  ;;  %v568_v24 = vadd.f32 %v1152_v48, %v471_v22  ;;  %v902_v25 = vpop.f32.mrb[10].mxu1 }
 0x24a   :  { %806 = vst [vmem:[#allocation11 + $0x18] sm:$0xff] %v782_v20   ;;  %v586_v26 = vmax.f32 %v570_v21, 0.0  ;;  %v571_v27 = vadd.f32 %v902_v25, %v1152_v48  ;;  %v474_v28 = vpop.f32.mrb[11].mxu1 }
 0x24b   :  { %805 = vst [vmem:[#allocation11 + $0x10] sm:$0xff] %v777_v23   ;;  %v584_v29 = vmax.f32 %v568_v24, 0.0  ;;  %v569_v30 = vadd.f32 %v1152_v48, %v474_v28 }
 0x24c   :  { %v587_v31 = vmax.f32 %v571_v27, 0.0  ;;  %v602_v33 = vmin.f32 %v586_v26, 6.0 }
 0x24d   :  { %v585_v32 = vmax.f32 %v569_v30, 0.0  ;;  %v600_v35 = vmin.f32 %v584_v29, 6.0 }
 0x24e   :  { %v603_v34 = vmin.f32 %v587_v31, 6.0 }
 0x24f   :  { %v601_v36 = vmin.f32 %v585_v32, 6.0  ;;  %v905_v37 = vpop.f32.mrb[12].mxu1 }
 0x250   :  { %v792_v38 = vpack.c.bf16 %v603_v34, %v602_v33  ;;  %v574_v39 = vadd.f32 %v905_v37, %v1152_v48  ;;  %v487_v40 = vpop.f32.mrb[13].mxu1 }
 0x251   :  { %v787_v41 = vpack.c.bf16 %v601_v36, %v600_v35  ;;  %v572_v42 = vadd.f32 %v1152_v48, %v487_v40  ;;  %v906_v43 = vpop.f32.mrb[14].mxu1 }
 0x252   :  { %808 = vst [vmem:[#allocation11 + $0x28] sm:$0xff] %v792_v38   ;;  %v590_v44 = vmax.f32 %v574_v39, 0.0  ;;  %v575_v45 = vadd.f32 %v906_v43, %v1152_v48  ;;  %v490_v46 = vpop.f32.mrb[15].mxu1 }
 0x253   :  { %807 = vst [vmem:[#allocation11 + $0x20] sm:$0xff] %v787_v41   ;;  %v588_v47 = vmax.f32 %v572_v42, 0.0  ;;  %v573_v49 = vadd.f32 %v1152_v48, %v490_v46 }
 0x254   :  { %v591_v50 = vmax.f32 %v575_v45, 0.0  ;;  %v606_v52 = vmin.f32 %v590_v44, 6.0 }
 0x255   :  { %v589_v51 = vmax.f32 %v573_v49, 0.0  ;;  %v604_v54 = vmin.f32 %v588_v47, 6.0 }
 0x256   :  { %v607_v53 = vmin.f32 %v591_v50, 6.0 }
 0x257   :  { %v605_v55 = vmin.f32 %v589_v51, 6.0 }
 0x258   :  { %v802_v56 = vpack.c.bf16 %v607_v53, %v606_v52 }
 0x259   :  { %v797_v57 = vpack.c.bf16 %v605_v55, %v604_v54 }
 0x25a   :  { %810 = vst [vmem:[#allocation11 + $0x38] sm:$0xff] %v802_v56  }
 0x25b   :  { %809 = vst [vmem:[#allocation11 + $0x30] sm:$0xff] %v797_v57  }
 0x25c   :  { %1037 = shalt.err (!%p1034_p8)
}
 0x25d   :  { %s1038_s16 = scalar_lea.hbm %s1189_s4, 1024 }
 0x25e   :  { %p1039_p9 = scmp.ne.s32.totalorder %s1189_s4, %s1038_s16  ;;  %p1042_p10 = scmp.lt.u32.totalorder %s1038_s16, %s1189_s4 }
 0x260   :  { %p1044_p11 = pnand %p1042_p10, %p1039_p9 }
 0x262   :  { %1047 = shalt.err (!%p1044_p11)
}
 0x263   :  { %699 = dma.vmem_to_hbm [thread:$0]  %s694_s1, 1024, %s1189_s4, [#allocation5], %s1058_s27, %s1058_s27, %s1059_s28  }
 0x264   :  { %1054 = dma.done.wait [#allocation5], 1024  }
 0x265   :  { %1055 = vsyncadd [#allocation5], 4294966272 }
 0x266   :  { %703 = vsyncpa [#allocation4], 1 }
 0x267   :  { %704 = vsyncpa [#allocation7], 1 }
 0x268   :  { %705 = vsyncpa [#allocation10], 1 }
 0x269   :  { %706 = vsyncpa [#allocation5], 1 }

</bundles_post_ra>
